<compile_context>
chip_gen: v6e
topology: v6e:2x2x1
jax: 0.10.0
libtpu: 0.0.40
codegen_flags: <defaults>
</compile_context>

<pallas_src>
import jax
import jax.numpy as jnp
from jax.experimental import pallas as pl
from jax.experimental.pallas import tpu as pltpu

_NEG_SLOPE = 0.01   # F.leaky_relu default negative_slope
_SUBLANE = 8


def _leaky_relu(x, slope=_NEG_SLOPE):
    return jnp.where(x > 0, x, slope * x)


def _round_up(n, m):
    return ((n + m - 1) // m) * m


def dqn_kernel(x_ref, w1_ref, b1_ref, w2_ref, b2_ref, w3_ref, b3_ref, o_ref):
    # All three matmuls accumulate in f32 on the MXU; bias-add + leaky_relu run
    # on the VPU in f32 and are free filler while the next dot is piped.
    x = x_ref[...]

    h = jnp.dot(x, w1_ref[...], preferred_element_type=jnp.float32) + b1_ref[...]
    h = _leaky_relu(h)

    h = jnp.dot(h.astype(w2_ref.dtype), w2_ref[...],
                preferred_element_type=jnp.float32) + b2_ref[...]
    h = _leaky_relu(h)

    h = jnp.dot(h.astype(w3_ref.dtype), w3_ref[...],
                preferred_element_type=jnp.float32) + b3_ref[...]
    h = _leaky_relu(h)

    o_ref[...] = h.astype(o_ref.dtype)


def prepare_params(params, compute_dtype=jnp.bfloat16):
    """Cast params ONCE (outside the forward loop).

    Weights -> compute_dtype (bf16 by default: MXU operands), biases -> f32
    (added to the f32 accumulator).  No padding: feature dims are used as-is.
    """
    prepared = {}
    for i in (1, 2, 3):
        prepared[f"w{i}"] = jnp.asarray(params[f"w{i}"], compute_dtype)
        prepared[f"b{i}"] = jnp.asarray(params[f"b{i}"], jnp.float32).reshape(1, -1)
    return prepared


def dqn_forward(x, params, *, batch_tile=2048, out_dtype=jnp.float32):
    """Fused forward pass of the DQN MLP in a single Pallas kernel.

    x      : (B, dim_state); cast to the weights' dtype at the call boundary
             (ideally the caller already supplies x in that dtype).
    params : output of prepare_params(): w1 (D, D//2), b1 (1, D//2),
             w2 (D//2, D//4), b2 (1, D//4), w3 (D//4, A), b3 (1, A)
    returns: (B, A) in out_dtype.
    """
    w1, b1 = params["w1"], params["b1"]
    w2, b2 = params["w2"], params["b2"]
    w3, b3 = params["w3"], params["b3"]

    B, D = x.shape
    H1, H2, A = w1.shape[1], w2.shape[1], w3.shape[1]
    cd = w1.dtype

    if x.dtype != cd:
        x = x.astype(cd)

    # ---- balanced batch tiling (batch is the only padded/tiled axis) --------
    num_tiles = max(-(-B // batch_tile), 1)
    if num_tiles == 1 and B >= 64:
        num_tiles = 2                      # v7x: give both TensorCores work
    if num_tiles == 1:
        TB, Bp = B, B                      # block == full array dim: no alignment needed
    else:
        TB = _round_up(-(-B // num_tiles), _SUBLANE)
        Bp = _round_up(B, TB)
    if Bp != B:
        # batch-only zero pad (at most ~one sublane group per tile of waste)
        x = jnp.zeros((Bp, D), cd).at[:B].set(x)

    grid = (Bp // TB,)
    resident = lambda i: (0, 0)            # weights/biases stay VMEM-resident

    isz = jnp.dtype(cd).itemsize
    osz = jnp.dtype(out_dtype).itemsize
    flops = 2 * Bp * (D * H1 + H1 * H2 + H2 * A)
    bytes_accessed = (Bp * D * isz                       # x
                      + (D * H1 + H1 * H2 + H2 * A) * isz  # weights
                      + (H1 + H2 + A) * 4                  # f32 biases
                      + Bp * A * osz)                      # output

    out = pl.pallas_call(
        dqn_kernel,
        out_shape=jax.ShapeDtypeStruct((Bp, A), out_dtype),
        grid=grid,
        in_specs=[
            pl.BlockSpec((TB, D), lambda i: (i, 0)),   # x: pipelined batch tiles
            pl.BlockSpec((D, H1), resident),
            pl.BlockSpec((1, H1), resident),
            pl.BlockSpec((H1, H2), resident),
            pl.BlockSpec((1, H2), resident),
            pl.BlockSpec((H2, A), resident),
            pl.BlockSpec((1, A), resident),
        ],
        out_specs=pl.BlockSpec((TB, A), lambda i: (i, 0)),
        compiler_params=pltpu.CompilerParams(
            dimension_semantics=("parallel",),         # shard batch tiles across TCs (v7x)
        ),
        cost_estimate=pl.CostEstimate(
            flops=flops, transcendentals=0, bytes_accessed=bytes_accessed),
    )(x, w1, b1, w2, b2, w3, b3)

    return out if Bp == B else out[:B]


def init_params(key, dim_state, dim_action):
    """Deterministic parameter init (PyTorch-Linear-like uniform bounds), f32."""
    dims = [dim_state, dim_state // 2, dim_state // 4, dim_action]
    params = {}
    keys = jax.random.split(key, 6)
    for i in range(3):
        fan_in, fan_out = dims[i], dims[i + 1]
        bound = 1.0 / jnp.sqrt(fan_in)
        params[f"w{i+1}"] = jax.random.uniform(
            keys[2 * i], (fan_in, fan_out), jnp.float32, -bound, bound)
        params[f"b{i+1}"] = jax.random.uniform(
            keys[2 * i + 1], (1, fan_out), jnp.float32, -bound, bound)
    return params


def dqn_reference(x, params):
    """Pure-JAX f32 reference of the same forward pass (matches the nn.Module:
    leaky_relu is applied after fc3 as well)."""
    h = _leaky_relu(x @ params["w1"] + params["b1"])
    h = _leaky_relu(h @ params["w2"] + params["b2"])
    return _leaky_relu(h @ params["w3"] + params["b3"])


if __name__ == "__main__":
    dim_state = 32
    dim_action = 4
    batch = 8

    key = jax.random.PRNGKey(0)
    k_x, k_p = jax.random.split(key)
    x = jax.random.normal(k_x, (batch, dim_state), jnp.float32)
    params = init_params(k_p, dim_state, dim_action)
    ref = dqn_reference(x, params)

    # f32-operand path: exact-ish parity with the reference.
    out_f32 = jax.block_until_ready(
        dqn_forward(x, prepare_params(params, jnp.float32)))
    assert out_f32.shape == (batch, dim_action)
    assert jnp.allclose(out_f32, ref, atol=1e-5, rtol=1e-5)

    # bf16-operand path (recommended default on v6e/v7x): f32 accumulation,
    # so only operand rounding error remains -> loose tolerance.
    out_bf16 = jax.block_until_ready(
        dqn_forward(x, prepare_params(params, jnp.bfloat16)))
    assert out_bf16.shape == (batch, dim_action)
    assert jnp.allclose(out_bf16, ref, atol=5e-2, rtol=5e-2)

    print("KERNEL_OK")
</pallas_src>

<mosaic_0001>
module attributes {stable_mosaic.version = 11 : i64} {
  func.func @dqn_kernel(%arg0: i32, %arg1: memref<8x32xf32, #tpu.memory_space<vmem>>, %arg2: memref<32x16xf32, #tpu.memory_space<vmem>>, %arg3: memref<1x16xf32, #tpu.memory_space<vmem>>, %arg4: memref<16x8xf32, #tpu.memory_space<vmem>>, %arg5: memref<1x8xf32, #tpu.memory_space<vmem>>, %arg6: memref<8x4xf32, #tpu.memory_space<vmem>>, %arg7: memref<1x4xf32, #tpu.memory_space<vmem>>, %arg8: memref<8x4xf32, #tpu.memory_space<vmem>>) attributes {dimension_semantics = [#tpu.dimension_semantics<parallel>], iteration_bounds = array<i64: 1>, scalar_prefetch = 0 : i64, scratch_operands = 0 : i64, tpu.core_type = #tpu.core_type<tc>, window_params = [{transform_indices = @transform_0, window_bounds = array<i64: 8, 32>}, {pipeline_mode = #tpu.pipeline_mode<synchronous>, transform_indices = @transform_1, window_bounds = array<i64: 32, 16>}, {pipeline_mode = #tpu.pipeline_mode<synchronous>, transform_indices = @transform_2, window_bounds = array<i64: 1, 16>}, {pipeline_mode = #tpu.pipeline_mode<synchronous>, transform_indices = @transform_3, window_bounds = array<i64: 16, 8>}, {pipeline_mode = #tpu.pipeline_mode<synchronous>, transform_indices = @transform_4, window_bounds = array<i64: 1, 8>}, {pipeline_mode = #tpu.pipeline_mode<synchronous>, transform_indices = @transform_5, window_bounds = array<i64: 8, 4>}, {pipeline_mode = #tpu.pipeline_mode<synchronous>, transform_indices = @transform_6, window_bounds = array<i64: 1, 4>}, {transform_indices = @transform_7, window_bounds = array<i64: 8, 4>}]} {
    %c0 = arith.constant 0 : index
    %c0_0 = arith.constant 0 : index
    %0 = vector.load %arg1[%c0, %c0_0] : memref<8x32xf32, #tpu.memory_space<vmem>>, vector<8x32xf32>
    %c0_1 = arith.constant 0 : index
    %c0_2 = arith.constant 0 : index
    %1 = vector.load %arg2[%c0_1, %c0_2] : memref<32x16xf32, #tpu.memory_space<vmem>>, vector<32x16xf32>
    %cst = arith.constant dense<0.000000e+00> : vector<8x16xf32>
    %2 = tpu.matmul %0, %1, %cst {dimension_numbers = #tpu.dot_dimension_numbers<[1], [0], [0], [1], [0, 0, 1, 1], [], []>} : vector<8x32xf32>, vector<32x16xf32>, vector<8x16xf32> -> vector<8x16xf32>
    %c0_3 = arith.constant 0 : index
    %c0_4 = arith.constant 0 : index
    %3 = vector.load %arg3[%c0_3, %c0_4] : memref<1x16xf32, #tpu.memory_space<vmem>>, vector<1x16xf32>
    %4 = vector.broadcast %3 : vector<1x16xf32> to vector<8x16xf32>
    %5 = arith.addf %2, %4 : vector<8x16xf32>
    %cst_5 = arith.constant 0.000000e+00 : f32
    %6 = vector.broadcast %cst_5 : f32 to vector<8x16xf32>
    %7 = arith.cmpf ogt, %5, %6 : vector<8x16xf32>
    %cst_6 = arith.constant 0.00999999977 : f32
    %8 = vector.broadcast %cst_6 : f32 to vector<8x16xf32>
    %9 = arith.mulf %8, %5 : vector<8x16xf32>
    %10 = arith.select %7, %5, %9 : vector<8x16xi1>, vector<8x16xf32>
    %c0_7 = arith.constant 0 : index
    %c0_8 = arith.constant 0 : index
    %11 = vector.load %arg4[%c0_7, %c0_8] : memref<16x8xf32, #tpu.memory_space<vmem>>, vector<16x8xf32>
    %cst_9 = arith.constant dense<0.000000e+00> : vector<8x8xf32>
    %12 = tpu.matmul %10, %11, %cst_9 {dimension_numbers = #tpu.dot_dimension_numbers<[1], [0], [0], [1], [0, 0, 1, 1], [], []>} : vector<8x16xf32>, vector<16x8xf32>, vector<8x8xf32> -> vector<8x8xf32>
    %c0_10 = arith.constant 0 : index
    %c0_11 = arith.constant 0 : index
    %13 = vector.load %arg5[%c0_10, %c0_11] : memref<1x8xf32, #tpu.memory_space<vmem>>, vector<1x8xf32>
    %14 = vector.broadcast %13 : vector<1x8xf32> to vector<8x8xf32>
    %15 = arith.addf %12, %14 : vector<8x8xf32>
    %cst_12 = arith.constant 0.000000e+00 : f32
    %16 = vector.broadcast %cst_12 : f32 to vector<8x8xf32>
    %17 = arith.cmpf ogt, %15, %16 : vector<8x8xf32>
    %cst_13 = arith.constant 0.00999999977 : f32
    %18 = vector.broadcast %cst_13 : f32 to vector<8x8xf32>
    %19 = arith.mulf %18, %15 : vector<8x8xf32>
    %20 = arith.select %17, %15, %19 : vector<8x8xi1>, vector<8x8xf32>
    %c0_14 = arith.constant 0 : index
    %c0_15 = arith.constant 0 : index
    %21 = vector.load %arg6[%c0_14, %c0_15] : memref<8x4xf32, #tpu.memory_space<vmem>>, vector<8x4xf32>
    %cst_16 = arith.constant dense<0.000000e+00> : vector<8x4xf32>
    %22 = tpu.matmul %20, %21, %cst_16 {dimension_numbers = #tpu.dot_dimension_numbers<[1], [0], [0], [1], [0, 0, 1, 1], [], []>} : vector<8x8xf32>, vector<8x4xf32>, vector<8x4xf32> -> vector<8x4xf32>
    %c0_17 = arith.constant 0 : index
    %c0_18 = arith.constant 0 : index
    %23 = vector.load %arg7[%c0_17, %c0_18] : memref<1x4xf32, #tpu.memory_space<vmem>>, vector<1x4xf32>
    %24 = vector.broadcast %23 : vector<1x4xf32> to vector<8x4xf32>
    %25 = arith.addf %22, %24 : vector<8x4xf32>
    %cst_19 = arith.constant 0.000000e+00 : f32
    %26 = vector.broadcast %cst_19 : f32 to vector<8x4xf32>
    %27 = arith.cmpf ogt, %25, %26 : vector<8x4xf32>
    %cst_20 = arith.constant 0.00999999977 : f32
    %28 = vector.broadcast %cst_20 : f32 to vector<8x4xf32>
    %29 = arith.mulf %28, %25 : vector<8x4xf32>
    %30 = arith.select %27, %25, %29 : vector<8x4xi1>, vector<8x4xf32>
    %c0_21 = arith.constant 0 : index
    %c0_22 = arith.constant 0 : index
    %31 = vector.load %arg8[%c0_21, %c0_22] : memref<8x4xf32, #tpu.memory_space<vmem>>, vector<8x4xf32>
    tpu.vector_store %arg8[%c0_21, %c0_22], %30 {strides = array<i32>} : memref<8x4xf32, #tpu.memory_space<vmem>>, vector<8x4xf32>,
    return
  }
  func.func @transform_0(%arg0: i32) -> (i32, i32) {
    %c0_i32 = arith.constant 0 : i32
    %c0_i32_0 = arith.constant 0 : i32
    return %arg0, %c0_i32 : i32, i32
  }
  func.func @transform_1(%arg0: i32) -> (i32, i32) {
    %c0_i32 = arith.constant 0 : i32
    %c0_i32_0 = arith.constant 0 : i32
    %c0_i32_1 = arith.constant 0 : i32
    return %c0_i32, %c0_i32_0 : i32, i32
  }
  func.func @transform_2(%arg0: i32) -> (i32, i32) {
    %c0_i32 = arith.constant 0 : i32
    %c0_i32_0 = arith.constant 0 : i32
    %c0_i32_1 = arith.constant 0 : i32
    return %c0_i32, %c0_i32_0 : i32, i32
  }
  func.func @transform_3(%arg0: i32) -> (i32, i32) {
    %c0_i32 = arith.constant 0 : i32
    %c0_i32_0 = arith.constant 0 : i32
    %c0_i32_1 = arith.constant 0 : i32
    return %c0_i32, %c0_i32_0 : i32, i32
  }
  func.func @transform_4(%arg0: i32) -> (i32, i32) {
    %c0_i32 = arith.constant 0 : i32
    %c0_i32_0 = arith.constant 0 : i32
    %c0_i32_1 = arith.constant 0 : i32
    return %c0_i32, %c0_i32_0 : i32, i32
  }
  func.func @transform_5(%arg0: i32) -> (i32, i32) {
    %c0_i32 = arith.constant 0 : i32
    %c0_i32_0 = arith.constant 0 : i32
    %c0_i32_1 = arith.constant 0 : i32
    return %c0_i32, %c0_i32_0 : i32, i32
  }
  func.func @transform_6(%arg0: i32) -> (i32, i32) {
    %c0_i32 = arith.constant 0 : i32
    %c0_i32_0 = arith.constant 0 : i32
    %c0_i32_1 = arith.constant 0 : i32
    return %c0_i32, %c0_i32_0 : i32, i32
  }
  func.func @transform_7(%arg0: i32) -> (i32, i32) {
    %c0_i32 = arith.constant 0 : i32
    %c0_i32_0 = arith.constant 0 : i32
    return %arg0, %c0_i32 : i32, i32
  }
}

</mosaic_0001>

<bundles_post_ra>
// kernel: tpu_custom_call.1
= control target key start
LH: loop header
LB: loop body
LE: loop exit
PB: predicated region body
PF: predicated region fallthrough
CT: control target
= control target key end

     0   :  { %v333_v0 = vmov 0.0   ;;  %vm334_vm0 = vmmov 0   ;;  %vm38_vm1 = vcmask 261120   ;;  %vm124_vm3 = vcmask 130048   ;;  %s414_s1 = inlined_call_operand.vmem [shape: f32[32,16], index: 1, kind: input, shape index: {}]   ;;  %s415_s0 = inlined_call_operand.vmem [shape: f32[8,32], index: 0, kind: input, shape index: {}]   ;;  %s416_s3 = inlined_call_operand.vmem [shape: f32[16,8], index: 3, kind: input, shape index: {}]   ;;  %s417_s2 = inlined_call_operand.vmem [shape: f32[1,16], index: 2, kind: input, shape index: {}]   ;;  %s418_s5 = inlined_call_operand.vmem [shape: f32[8,4], index: 5, kind: input, shape index: {}]   ;;  %s419_s4 = inlined_call_operand.vmem [shape: f32[1,8], index: 4, kind: input, shape index: {}]   ;;  %s420_s6 = inlined_call_operand.vmem [shape: f32[1,4], index: 6, kind: input, shape index: {}]   ;;  %s421_s7 = inlined_call_operand.vmem [shape: f32[8,4], index: 7, kind: output, shape index: {}]  }
   0x1   :  { %308 = vmatprep.subr.mxu0 %v333_v0  ;;  %v30_v1 = vld [vmem:[%s414_s1 + $0x18] sm:$0xff]  ;;  %v29_v2 = vld [vmem:[%s414_s1 + $0x10] sm:$0xff]  ;;  %316 = vmatprep.mubr.msk.f32.mxu0 %vm334_vm0, %v333_v0  ;;  %v28_v3 = vld [vmem:[%s414_s1 + $0x8] sm:$0xff]  ;;  %vm209_vm5 = vcmask 64512   ;;  %vm286_vm7 = vcmask 31744  }
   0x2   :  { %309 = vmatpush3.msra.mxu0 %v30_v1  ;;  %319 = vmatprep.subr.mxu1 %v333_v0  ;;  %v27_v4 = vld [vmem:[%s414_s1] sm:$0xff]  ;;  %v116_v6 = vld [vmem:[%s416_s3 + $0x8] sm:$0xff] }
   0x3   :  { %310 = vmatprep.subr.mxu0 %v333_v0  ;;  %323 = vmatprep.mubr.msk.f32.mxu1 %vm334_vm0, %v333_v0  ;;  %v26_v5 = vld [vmem:[%s415_s0] sm:$0xff] }
   0x4   :  { %311 = vmatpush3.msra.mxu0 %v29_v2  ;;  %320 = vmatpush3.msra.mxu1 %v116_v6  ;;  %v115_v7 = vld [vmem:[%s416_s3] sm:$0xff] }
   0x5   :  { %312 = vmatprep.subr.mxu0 %v333_v0  ;;  %321 = vmatprep.subr.mxu1 %v333_v0  ;;  %v292_v8 = vld [vmem:[%s417_s2] ss:$0 sm:$0xff] }
   0x6   :  { %313 = vmatpush3.msra.mxu0 %v28_v3  ;;  %322 = vmatpush3.msra.mxu1 %v115_v7  ;;  %v201_v14 = vld [vmem:[%s418_s5] sm:$0xff] }
   0x7   :  { %314 = vmatprep.subr.mxu0 %v333_v0  ;;  %326 = vmatprep.subr.mxu1 %v333_v0  ;;  %v294_v15 = vld [vmem:[%s419_s4] ss:$0 sm:$0xff] }
   0x8   :  { %315 = vmatpush3.msra.mxu0 %v27_v4  ;;  %v296_v21 = vld [vmem:[%s420_s6] ss:$0 sm:$0xff] }
   0x9   :  { %317 = vmatmul.mubr.msk.f32.vlgmr.msra.gmra.mxu0 %vm38_vm1, %v26_v5 }
  0xc9   :  { %v108_v9 = vpop.f32.mrf.mxu0 }
  0xca   :  { %v109_v10 = vadd.f32 %v292_v8, %v108_v9 }
  0xcb   :  { %v318_v11 = vpop.f32.mrf.mxu0 }
  0xcc   :  { %vm112_vm2 = vcmp.gt.f32.partialorder %v109_v10, 0.0  ;;  %v113_v12 = vmul.f32 0.01, %v109_v10 }
  0xce   :  { %v114_v13 = vsel %vm112_vm2, %v109_v10, %v113_v12 }
  0xcf   :  { %324 = vmatmul.mubr.msk.f32.vlgmr.msra.gmra.mxu1 %vm124_vm3, %v114_v13 }
  0xd0   :  { %328 = vmatprep.mubr.msk.f32.mxu1 %vm334_vm0, %v333_v0  ;;  %327 = vmatpush3.msra.mxu1 %v201_v14 }
 0x18f   :  { %v194_v16 = vpop.f32.mrf.mxu1 }
 0x190   :  { %v195_v17 = vadd.f32 %v294_v15, %v194_v16 }
 0x191   :  { %v325_v18 = vpop.f32.mrf.mxu1 }
 0x192   :  { %vm198_vm4 = vcmp.gt.f32.partialorder %v195_v17, 0.0  ;;  %v199_v19 = vmul.f32 0.01, %v195_v17 }
 0x194   :  { %v200_v20 = vsel %vm198_vm4, %v195_v17, %v199_v19 }
 0x195   :  { %329 = vmatmul.mubr.msk.f32.vlgmr.msra.gmra.mxu1 %vm209_vm5, %v200_v20 }
 0x255   :  { %v279_v22 = vpop.f32.mrf.mxu1 }
 0x256   :  { %v280_v23 = vadd.f32 %v296_v21, %v279_v22 }
 0x257   :  { %v330_v24 = vpop.f32.mrf.mxu1 }
 0x258   :  { %vm283_vm6 = vcmp.gt.f32.partialorder %v280_v23, 0.0  ;;  %v284_v25 = vmul.f32 0.01, %v280_v23 }
 0x25a   :  { %v285_v26 = vsel %vm283_vm6, %v280_v23, %v284_v25 }
 0x25b   :  { %287 = vst.msk [vmem:[%s421_s7] sm:$0xff] %vm286_vm7, %v285_v26 }

</bundles_post_ra>
